<compile_context>
chip_gen: v7x
topology: tpu7x:2x2x1
jax: 0.10.0
libtpu: 0.0.40
codegen_flags: <defaults>
</compile_context>

<pallas_src>
import jax
import jax.numpy as jnp
from jax import lax
from jax.experimental import pallas as pl
from jax.experimental.pallas import tpu as pltpu


# ------------------------------ kernels ------------------------------------ #

def _rope_kernel_roll(x_ref, cos_ref, sin_ref, o_ref):
    """D % 128 == 0 path: rotate_half via a single XLU lane rotation."""
    c = cos_ref[...]                       # (tS, D)
    s = sin_ref[...]
    half = x_ref.shape[-1] // 2
    for b in range(x_ref.shape[0]):        # B is small & static -> unrolled
        x = x_ref[b]                       # (tS, D)
        rot = pltpu.roll(x, shift=half, axis=1)   # cat(x2, x1); sign in table
        o_ref[b] = x * c + rot * s


def _make_packed_kernel(D):
    """D < 128, 128 % D == 0: g = 128/D positions packed per 128-lane row.

    Within each D-wide group we need rot[p] = x[(p + D/2) mod D]; build it from
    two full-axis rolls (+-D/2) selected by a lane mask (cross-group leakage is
    masked out by the where).
    """
    half = D // 2

    def kernel(x_ref, cos_ref, sin_ref, o_ref):
        c = cos_ref[...]                   # (tS, 128)
        s = sin_ref[...]
        n = x_ref.shape[-1]                # 128
        lane = lax.broadcasted_iota(jnp.int32, (x_ref.shape[1], n), 1)
        first_half = (lane % D) < half
        for b in range(x_ref.shape[0]):
            x = x_ref[b]                   # (tS, 128)
            rot = jnp.where(first_half,
                            pltpu.roll(x, shift=n - half, axis=1),  # x[l + D/2]
                            pltpu.roll(x, shift=half, axis=1))      # x[l - D/2]
            o_ref[b] = x * c + rot * s

    return kernel


def _rope_kernel_slice(x_ref, cos_ref, sin_ref, o_ref):
    """Fallback for D neither a multiple of 128 nor a divisor of 128."""
    c = cos_ref[...]
    s = sin_ref[...]
    half = x_ref.shape[-1] // 2
    for b in range(x_ref.shape[0]):
        x = x_ref[b]
        rot = jnp.concatenate([x[:, half:], x[:, :half]], axis=-1)
        o_ref[b] = x * c + rot * s


# ------------------------------ wrapper ------------------------------------ #

def make_rope_tables(seq_len, dim, dtype=jnp.float32):
    """Build (cos_plus1, sin_signed) once; reuse across forward calls.

    Keep dtype == x.dtype (f32 tables for f32 x preserves 1e-5 parity with the
    PyTorch module; only downcast when x itself is low precision).
    """
    inv_freq = 1.0 / (10000.0 ** (jnp.arange(0, dim, 2, dtype=jnp.float32) / dim))
    t = jnp.arange(seq_len, dtype=jnp.float32)
    freqs = jnp.einsum("i,j->ij", t, inv_freq)                  # (S, D/2)
    cos_h = jnp.cos(freqs)
    sin_h = jnp.sin(freqs)
    cos_plus1 = jnp.concatenate([cos_h, cos_h], axis=-1) + 1.0  # cos(emb)+1 (residual folded)
    sin_signed = jnp.concatenate([-sin_h, sin_h], axis=-1)      # rotate_half sign folded
    return cos_plus1.astype(dtype), sin_signed.astype(dtype)


def _choose_seq_tile(s_rows, batch, row_d, itemsize, sub):
    """Byte-based sequence-row tile: ~4 MiB x tile, <=~24 MiB working set."""
    x_row_bytes = batch * row_d * itemsize
    ws_row_bytes = 2 * (2 * batch + 2) * row_d * itemsize   # x,out,cos,sin double-buffered
    tile_target = 4 << 20                                   # v7x-sized streaming tile
    ws_budget = 24 << 20                                    # under the 32 MiB vmem limit
    cap = min(tile_target // x_row_bytes, ws_budget // ws_row_bytes)
    cap = max(cap, sub)
    cap -= cap % sub
    if s_rows <= cap:
        # One tile fits; still split in two if each half is >= ~1 MiB so v7x's
        # two TensorCores both get a grid step.
        half = (s_rows // 2) - ((s_rows // 2) % sub)
        if half >= sub and half * x_row_bytes >= (1 << 20):
            return half
        return s_rows
    for ts in range(cap, sub - 1, -sub):                    # prefer an exact divisor
        if s_rows % ts == 0:
            return ts
    return cap                                              # ragged tail handled by cdiv grid


def rotary_positional_encoding(x, tables=None, *, max_seq_len=2048,
                               seq_tile=None, donate_x=False):
    """x: (B, S, D). Returns x * cos + rotate_half(x) * sin + x.

    seq_tile (if given) is in rows of the internal layout: original positions
    for D >= 128, packed 128-lane rows (g = 128/D positions each) for small D.
    donate_x=True aliases x -> out (use with jit donate_argnums to skip the copy).
    """
    B, S, D = x.shape
    assert S <= max_seq_len
    assert D % 2 == 0

    if tables is None:
        tables = make_rope_tables(S, D, x.dtype)
    cos_p1, sin_sg = tables

    itemsize = jnp.dtype(x.dtype).itemsize
    sub = 8 * (4 // itemsize)        # dtype-aware sublane granularity: f32 8, bf16 16, i8 32

    # ---- layout selection ---------------------------------------------------
    packed = (D < 128) and (128 % D == 0) and ((S * D) % 128 == 0)
    if packed:
        g = 128 // D
        row_d, s_rows = 128, S // g
        x_in = x.reshape(B, s_rows, row_d)
        cos_in = cos_p1.reshape(s_rows, row_d)
        sin_in = sin_sg.reshape(s_rows, row_d)
        kernel = _make_packed_kernel(D)
    else:
        row_d, s_rows = D, S
        x_in, cos_in, sin_in = x, cos_p1, sin_sg
        kernel = _rope_kernel_roll if D % 128 == 0 else _rope_kernel_slice

    # NOTE: batch is folded into the block; for extremely large B one would add
    # a batch grid axis instead (not needed for these shapes).
    tS = seq_tile if seq_tile is not None else _choose_seq_tile(s_rows, B, row_d, itemsize, sub)
    assert tS == s_rows or tS % sub == 0, "seq tile must be a multiple of the sublane pack or full S"

    grid = (pl.cdiv(s_rows, tS),)    # single parallel axis -> megacore splits on sequence

    out = pl.pallas_call(
        kernel,
        out_shape=jax.ShapeDtypeStruct((B, s_rows, row_d), x.dtype),
        grid_spec=pltpu.PrefetchScalarGridSpec(
            num_scalar_prefetch=0,
            grid=grid,
            in_specs=[
                pl.BlockSpec((B, tS, row_d), lambda s: (0, s, 0)),   # x tile (batch folded in)
                pl.BlockSpec((tS, row_d), lambda s: (s, 0)),         # cos+1 (shared over batch)
                pl.BlockSpec((tS, row_d), lambda s: (s, 0)),         # signed sin
            ],
            out_specs=pl.BlockSpec((B, tS, row_d), lambda s: (0, s, 0)),
        ),
        compiler_params=pltpu.CompilerParams(
            dimension_semantics=("parallel",),
            vmem_limit_bytes=32 * 1024 * 1024,
        ),
        input_output_aliases=({0: 0} if donate_x else {}),
    )(x_in, cos_in, sin_in)

    return out.reshape(B, S, D) if packed else out


# ------------------------------ reference ----------------------------------- #

def _reference(x):
    """Pure-JAX reference mirroring the PyTorch module exactly."""
    S, D = x.shape[-2], x.shape[-1]
    inv_freq = 1.0 / (10000.0 ** (jnp.arange(0, D, 2, dtype=jnp.float32) / D))
    t = jnp.arange(S, dtype=jnp.float32)
    freqs = jnp.einsum("i,j->ij", t, inv_freq)
    emb = jnp.concatenate([freqs, freqs], axis=-1)
    cos, sin = jnp.cos(emb), jnp.sin(emb)
    half = D // 2
    rot = jnp.concatenate([-x[..., half:], x[..., :half]], axis=-1)
    return x * cos + rot * sin + x


if __name__ == "__main__":
    root = jax.random.PRNGKey(0)
    k1, k2, k3, k4, k5 = jax.random.split(root, 5)

    # 1) Primary shape from the module spec: batch=2, seq=8, hidden=32.
    #    Exercises the lane-dense packed path (4 positions per 128-lane row).
    x = jax.random.normal(k1, (2, 8, 32), dtype=jnp.float32)
    out = jax.block_until_ready(rotary_positional_encoding(x))
    assert out.shape == x.shape and out.dtype == x.dtype
    assert jnp.allclose(out, _reference(x), atol=1e-5, rtol=1e-5), "mismatch (D=32 packed)"

    # 2) Lane-aligned hidden dim: pltpu.roll path.
    x2 = jax.random.normal(k2, (2, 8, 128), dtype=jnp.float32)
    out2 = jax.block_until_ready(rotary_positional_encoding(x2))
    assert jnp.allclose(out2, _reference(x2), atol=1e-5, rtol=1e-5), "mismatch (D=128)"

    # 3) Ragged multi-tile grid along the sequence axis (24 rows, tile 16).
    x3 = jax.random.normal(k3, (2, 24, 128), dtype=jnp.float32)
    out3 = jax.block_until_ready(rotary_positional_encoding(x3, seq_tile=16))
    assert jnp.allclose(out3, _reference(x3), atol=1e-5, rtol=1e-5), "mismatch (ragged S)"

    # 4) Packed path with multiple grid steps (64 positions -> 16 packed rows, tile 8).
    x4 = jax.random.normal(k4, (1, 64, 32), dtype=jnp.float32)
    out4 = jax.block_until_ready(rotary_positional_encoding(x4, seq_tile=8))
    assert jnp.allclose(out4, _reference(x4), atol=1e-5, rtol=1e-5), "mismatch (packed tiled)"

    # 5) x -> out aliasing with a donated input (no extra HBM allocation / copy).
    x5 = jax.random.normal(k5, (2, 16, 128), dtype=jnp.float32)
    expected5 = _reference(x5)                       # compute before donating x5
    f = jax.jit(lambda xx: rotary_positional_encoding(xx, donate_x=True), donate_argnums=0)
    out5 = jax.block_until_ready(f(x5))
    assert jnp.allclose(out5, expected5, atol=1e-5, rtol=1e-5), "mismatch (aliased)"

    print("KERNEL_OK")
</pallas_src>

<mosaic_0001>
module attributes {stable_mosaic.version = 11 : i64} {
  func.func @kernel(%arg0: i32, %arg1: memref<2x2x128xf32, #tpu.memory_space<vmem>>, %arg2: memref<2x128xf32, #tpu.memory_space<vmem>>, %arg3: memref<2x128xf32, #tpu.memory_space<vmem>>, %arg4: memref<2x2x128xf32, #tpu.memory_space<vmem>>) attributes {dimension_semantics = [#tpu.dimension_semantics<parallel>], iteration_bounds = array<i64: 1>, scalar_prefetch = 0 : i64, scratch_operands = 0 : i64, tpu.core_type = #tpu.core_type<tc>, window_params = [{transform_indices = @transform_0, window_bounds = array<i64: 2, 2, 128>}, {transform_indices = @transform_1, window_bounds = array<i64: 2, 128>}, {transform_indices = @transform_2, window_bounds = array<i64: 2, 128>}, {transform_indices = @transform_3, window_bounds = array<i64: 2, 2, 128>}]} {
    %c0 = arith.constant 0 : index
    %c0_0 = arith.constant 0 : index
    %0 = vector.load %arg2[%c0, %c0_0] : memref<2x128xf32, #tpu.memory_space<vmem>>, vector<2x128xf32>
    %c0_1 = arith.constant 0 : index
    %c0_2 = arith.constant 0 : index
    %1 = vector.load %arg3[%c0_1, %c0_2] : memref<2x128xf32, #tpu.memory_space<vmem>>, vector<2x128xf32>
    %2 = tpu.iota {dimensions = array<i32: 1>} : vector<2x128xi32>
    %c32_i32 = arith.constant 32 : i32
    %c0_i32 = arith.constant 0 : i32
    %3 = arith.cmpi eq, %c32_i32, %c0_i32 : i32
    %c1_i32 = arith.constant 1 : i32
    %4 = arith.select %3, %c1_i32, %c32_i32 : i32
    %5 = vector.broadcast %4 : i32 to vector<2x128xi32>
    %6 = arith.remsi %2, %5 : vector<2x128xi32>
    %c0_i32_3 = arith.constant 0 : i32
    %7 = vector.broadcast %c0_i32_3 : i32 to vector<2x128xi32>
    %8 = arith.cmpi ne, %6, %7 : vector<2x128xi32>
    %c0_i32_4 = arith.constant 0 : i32
    %9 = vector.broadcast %c0_i32_4 : i32 to vector<2x128xi32>
    %10 = arith.cmpi slt, %6, %9 : vector<2x128xi32>
    %c0_i32_5 = arith.constant 0 : i32
    %11 = arith.cmpi slt, %4, %c0_i32_5 : i32
    %12 = vector.broadcast %11 : i1 to vector<2x128xi1>
    %13 = vector.broadcast %12 : vector<2x128xi1> to vector<2x128xi1>
    %14 = arith.xori %10, %13 : vector<2x128xi1>
    %15 = arith.andi %14, %8 : vector<2x128xi1>
    %16 = vector.broadcast %4 : i32 to vector<2x128xi32>
    %17 = arith.addi %6, %16 : vector<2x128xi32>
    %18 = arith.select %15, %17, %6 : vector<2x128xi1>, vector<2x128xi32>
    %c16_i32 = arith.constant 16 : i32
    %19 = vector.broadcast %c16_i32 : i32 to vector<2x128xi32>
    %20 = arith.cmpi slt, %18, %19 : vector<2x128xi32>
    %c0_6 = arith.constant 0 : index
    %c0_7 = arith.constant 0 : index
    %c0_8 = arith.constant 0 : index
    %21 = vector.load %arg1[%c0_6, %c0_7, %c0_8] : memref<2x2x128xf32, #tpu.memory_space<vmem>>, vector<1x2x128xf32>
    %22 = vector.shape_cast %21 : vector<1x2x128xf32> to vector<2x128xf32>
    %c112_i32 = arith.constant 112 : i32
    %23 = tpu.dynamic_rotate %22 by %c112_i32 dim 1 : vector<2x128xf32>, i32 -> vector<2x128xf32>
    %c16_i32_9 = arith.constant 16 : i32
    %24 = tpu.dynamic_rotate %22 by %c16_i32_9 dim 1 : vector<2x128xf32>, i32 -> vector<2x128xf32>
    %25 = arith.select %20, %23, %24 : vector<2x128xi1>, vector<2x128xf32>
    %26 = arith.mulf %22, %0 : vector<2x128xf32>
    %27 = arith.mulf %25, %1 : vector<2x128xf32>
    %28 = arith.addf %26, %27 : vector<2x128xf32>
    %c0_10 = arith.constant 0 : index
    %c0_11 = arith.constant 0 : index
    %c0_12 = arith.constant 0 : index
    %29 = vector.load %arg4[%c0_10, %c0_11, %c0_12] : memref<2x2x128xf32, #tpu.memory_space<vmem>>, vector<1x2x128xf32>
    %30 = vector.shape_cast %29 : vector<1x2x128xf32> to vector<2x128xf32>
    %31 = vector.shape_cast %28 : vector<2x128xf32> to vector<1x2x128xf32>
    tpu.vector_store %arg4[%c0_10, %c0_11, %c0_12], %31 {strides = array<i32>} : memref<2x2x128xf32, #tpu.memory_space<vmem>>, vector<1x2x128xf32>,
    %c1 = arith.constant 1 : index
    %c0_13 = arith.constant 0 : index
    %c0_14 = arith.constant 0 : index
    %32 = vector.load %arg1[%c1, %c0_13, %c0_14] : memref<2x2x128xf32, #tpu.memory_space<vmem>>, vector<1x2x128xf32>
    %33 = vector.shape_cast %32 : vector<1x2x128xf32> to vector<2x128xf32>
    %c112_i32_15 = arith.constant 112 : i32
    %34 = tpu.dynamic_rotate %33 by %c112_i32_15 dim 1 : vector<2x128xf32>, i32 -> vector<2x128xf32>
    %c16_i32_16 = arith.constant 16 : i32
    %35 = tpu.dynamic_rotate %33 by %c16_i32_16 dim 1 : vector<2x128xf32>, i32 -> vector<2x128xf32>
    %36 = arith.select %20, %34, %35 : vector<2x128xi1>, vector<2x128xf32>
    %37 = arith.mulf %33, %0 : vector<2x128xf32>
    %38 = arith.mulf %36, %1 : vector<2x128xf32>
    %39 = arith.addf %37, %38 : vector<2x128xf32>
    %c1_17 = arith.constant 1 : index
    %c0_18 = arith.constant 0 : index
    %c0_19 = arith.constant 0 : index
    %40 = vector.load %arg4[%c1_17, %c0_18, %c0_19] : memref<2x2x128xf32, #tpu.memory_space<vmem>>, vector<1x2x128xf32>
    %41 = vector.shape_cast %40 : vector<1x2x128xf32> to vector<2x128xf32>
    %42 = vector.shape_cast %39 : vector<2x128xf32> to vector<1x2x128xf32>
    tpu.vector_store %arg4[%c1_17, %c0_18, %c0_19], %42 {strides = array<i32>} : memref<2x2x128xf32, #tpu.memory_space<vmem>>, vector<1x2x128xf32>,
    return
  }
  func.func @transform_0(%arg0: i32) -> (i32, i32, i32) {
    %c0_i32 = arith.constant 0 : i32
    %c0_i32_0 = arith.constant 0 : i32
    %c0_i32_1 = arith.constant 0 : i32
    return %c0_i32, %arg0, %c0_i32_0 : i32, i32, i32
  }
  func.func @transform_1(%arg0: i32) -> (i32, i32) {
    %c0_i32 = arith.constant 0 : i32
    %c0_i32_0 = arith.constant 0 : i32
    return %arg0, %c0_i32 : i32, i32
  }
  func.func @transform_2(%arg0: i32) -> (i32, i32) {
    %c0_i32 = arith.constant 0 : i32
    %c0_i32_0 = arith.constant 0 : i32
    return %arg0, %c0_i32 : i32, i32
  }
  func.func @transform_3(%arg0: i32) -> (i32, i32, i32) {
    %c0_i32 = arith.constant 0 : i32
    %c0_i32_0 = arith.constant 0 : i32
    %c0_i32_1 = arith.constant 0 : i32
    return %c0_i32, %arg0, %c0_i32_0 : i32, i32, i32
  }
}

</mosaic_0001>

<bundles_post_ra>
// kernel: tpu_custom_call.1
= control target key start
LH: loop header
LB: loop body
LE: loop exit
PB: predicated region body
PF: predicated region fallthrough
CT: control target
= control target key end

     0   :  { %8 = vsyncpa [#allocation3], 0  ;;  %s201_s0 = inlined_call_operand.hbm [shape: f32[2,2,128], index: 0, kind: input, shape index: {}]   ;;  %s202_s1 = inlined_call_operand.vmem [shape: f32[2,128], index: 1, kind: input, shape index: {}]   ;;  %s203_s2 = inlined_call_operand.vmem [shape: f32[2,128], index: 2, kind: input, shape index: {}]   ;;  %s204_s3 = inlined_call_operand.hbm [shape: f32[2,2,128], index: 3, kind: output, shape index: {}]  }
   0x1   :  { %9 = vsyncpa [#allocation4], 0  ;;  %s139_s12 = smov [#allocation2]   ;;  %s91_s16 = scalar_lea.hbm %s201_s0, 64 }
   0x2   :  { %s15_s13 = sshll.u32 %s139_s12, 4  ;;  %p92_p0 = scmp.ne.s32.totalorder %s201_s0, %s91_s16  ;;  %s16_s13 = int_to_ptr.vmem [resolvable:$true] %s15_s13 }
   0x3   :  { %p95_p1 = scmp.lt.u32.totalorder %s91_s16, %s201_s0 }
   0x5   :  { %p97_p2 = pnand %p95_p1, %p92_p0 }
   0x7   :  { %100 = shalt.err (!%p97_p2)
}
   0x8   :  { %s101_s21 = scalar_lea.vmem %s16_s13, 64  ;;  %p106_p4 = scmp.lt.s32.totalorder %s16_s13, %s16_s13 }
   0x9   :  { %p102_p3 = scmp.ne.s32.totalorder %s16_s13, %s101_s21  ;;  %p107_p5 = scmp.lt.s32.totalorder %s101_s21, %s101_s21 }
   0xb   :  { %p108_p6 = por %p107_p5, %p106_p4 }
   0xd   :  { %p109_p7 = pnand %p108_p6, %p102_p3 }
   0xf   :  { %112 = shalt.err (!%p109_p7)
}
  0x10   :  { %s140_s22 = smov 32   ;;  %s141_s23 = smov 2  }
  0x11   :  { %21 = dma.hbm_to_vmem [thread:$0]  %s201_s0, 64, %s16_s13, [#allocation3], %s140_s22, %s140_s22, %s141_s23  }
  0x12   :  { %135 = dma.done.wait [#allocation3], 64  }
  0x13   :  { %136 = vsyncadd [#allocation3], 4294967232  ;;  %v57_v0 = vld [vmem:[#allocation2 + $0x2] sm:$0x3]  ;;  %v46_v1 = vld [vmem:[#allocation2] sm:$0x3]  ;;  %v31_v2 = vlaneseq }
  0x14   :  { %s142_s26 = smov 112   ;;  %s143_s27 = smov 16   ;;  %v29_v7 = vld [vmem:[%s202_s1] sm:$0x3] }
  0x15   :  { %58 = vrot.lane.b32.xlu1 %v57_v0, %s142_s26  ;;  %47 = vrot.lane.b32.xlu0 %v46_v1, %s142_s26  ;;  %v32_v3 = vand.u32 127, %v31_v2  ;;  %v30_v8 = vld [vmem:[%s203_s2] sm:$0x3]  ;;  %v63_v9 = vmul.f32 %v57_v0, %v29_v7  ;;  %v52_v10 = vmul.f32 %v46_v1, %v29_v7  ;;  %s144_s4 = smov [#allocation5]  }
  0x16   :  { %s73_s5 = sshll.u32 %s144_s4, 4  ;;  %s74_s5 = int_to_ptr.vmem [resolvable:$true] %s73_s5 }
  0x17   :  { %v37_v4 = vand.u32 31, %v32_v3  ;;  %s113_s1 = scalar_lea.vmem %s74_s5, 64  ;;  %p118_p9 = scmp.lt.s32.totalorder %s74_s5, %s74_s5 }
  0x18   :  { %p114_p8 = scmp.ne.s32.totalorder %s74_s5, %s113_s1  ;;  %p119_p10 = scmp.lt.s32.totalorder %s113_s1, %s113_s1 }
  0x19   :  { %60 = vrot.lane.b32.xlu1 %v57_v0, %s143_s27  ;;  %49 = vrot.lane.b32.xlu0 %v46_v1, %s143_s27  ;;  %vm45_vm0 = vcmp.lt.s32.totalorder %v37_v4, 16 }
  0x1a   :  { %p120_p11 = por %p119_p10, %p118_p9 }
  0x1c   :  { %p121_p12 = pnand %p120_p11, %p114_p8 }
  0x87   :  { %v59_v5 = vpop.permute.xlu1 %58  ;;  %v48_v6 = vpop.permute.xlu0 %47 }
  0x8b   :  { %v61_v11 = vpop.permute.xlu1 %60  ;;  %v50_v12 = vpop.permute.xlu0 %49 }
  0x8c   :  { %v62_v13 = vsel %vm45_vm0, %v59_v5, %v61_v11  ;;  %v51_v14 = vsel %vm45_vm0, %v48_v6, %v50_v12 }
  0x8d   :  { %v64_v15 = vmul.f32 %v62_v13, %v30_v8  ;;  %v53_v16 = vmul.f32 %v51_v14, %v30_v8 }
  0x8f   :  { %v65_v17 = vadd.f32 %v64_v15, %v63_v9  ;;  %v54_v18 = vadd.f32 %v53_v16, %v52_v10 }
  0x91   :  { %67 = vst [vmem:[#allocation5 + $0x2] sm:$0x3] %v65_v17  ;;  %55 = vst [vmem:[#allocation5] sm:$0x3] %v54_v18 }
  0x92   :  { %124 = shalt.err (!%p121_p12)
}
  0x93   :  { %s125_s7 = scalar_lea.hbm %s204_s3, 64 }
  0x94   :  { %p126_p13 = scmp.ne.s32.totalorder %s204_s3, %s125_s7  ;;  %p129_p0 = scmp.lt.u32.totalorder %s125_s7, %s204_s3 }
  0x96   :  { %p131_p1 = pnand %p129_p0, %p126_p13 }
  0x98   :  { %134 = shalt.err (!%p131_p1)
}
  0x99   :  { %79 = dma.vmem_to_hbm [thread:$0]  %s74_s5, 64, %s204_s3, [#allocation4], %s140_s22, %s140_s22, %s141_s23  }
  0x9a   :  { %137 = dma.done.wait [#allocation4], 64  }
  0x9b   :  { %138 = vsyncadd [#allocation4], 4294967232 }
  0x9c   :  { %83 = vsyncpa [#allocation3], 1 }
  0x9d   :  { %84 = vsyncpa [#allocation4], 1 }

</bundles_post_ra>
